<compile_context>
chip_gen: v6e
topology: v6e:2x2x1
jax: 0.10.0
libtpu: 0.0.40
codegen_flags: <defaults>
</compile_context>

<pallas_src>
import functools

import jax
import jax.numpy as jnp
from jax.experimental import pallas as pl
from jax.experimental.pallas import tpu as pltpu


def _round_up(x, m):
    return ((x + m - 1) // m) * m


def _mlp_decoder_kernel(x_ref, w1_ref, b1_ref, w2_ref, b2_ref, w3_ref, b3_ref,
                        o_ref):
    # x_ref: (C_in, TL) tile of positions (L on lanes), f32 or bf16.
    # wN_ref: transposed (out, in) bf16 weights, resident in VMEM.
    # bN_ref: (out, 1) f32 bias columns (broadcast along lanes).
    x = x_ref[...].astype(jnp.bfloat16)   # free VPU cast, hidden under MXU

    h1 = jnp.dot(w1_ref[...], x, preferred_element_type=jnp.float32)
    h1 = jnp.maximum(h1 + b1_ref[...], 0.0).astype(jnp.bfloat16)

    h2 = jnp.dot(w2_ref[...], h1, preferred_element_type=jnp.float32)
    h2 = jnp.maximum(h2 + b2_ref[...], 0.0).astype(jnp.bfloat16)

    out = jnp.dot(w3_ref[...], h2, preferred_element_type=jnp.float32)
    o_ref[...] = (out + b3_ref[...]).astype(o_ref.dtype)


def mlp_decoder_forward(x, params, *, tl=512):
    """x: (B, C_in, L) float32. Returns (B, num_classes, L) float32."""
    w1, b1, w2, b2, w3, b3 = params
    B, C_in, L = x.shape
    H = w1.shape[1]
    NC = w3.shape[1]

    # L-tile: multiple of 128, no larger than the (128-padded) sequence.
    tl = max(128, _round_up(tl, 128))
    tl = min(tl, _round_up(L, 128))
    L_pad = _round_up(L, tl)

    if L_pad != L:
        # Padding copy is unavoidable here; fuse the bf16 cast into it so the
        # padded copy (and the kernel's read of it) is half-size.
        x_in = jnp.pad(x.astype(jnp.bfloat16),
                       ((0, 0), (0, 0), (0, L_pad - L)))
    else:
        # No wrapper pass over x at all; the kernel casts in VMEM.
        x_in = x

    # Weights transposed to (out, in) bf16 so the matmuls are W^T @ X with L
    # on the lane dimension.  Biases stay f32 column vectors.
    w1t = w1.T.astype(jnp.bfloat16)
    w2t = w2.T.astype(jnp.bfloat16)
    w3t = w3.T.astype(jnp.bfloat16)
    b1c = b1.reshape(H, 1).astype(jnp.float32)
    b2c = b2.reshape(H, 1).astype(jnp.float32)
    b3c = b3.reshape(NC, 1).astype(jnp.float32)

    grid = (B, L_pad // tl)

    # Advisory cost estimate for XLA's scheduler.
    flops = 2 * B * L_pad * (C_in * H + H * H + H * NC)
    bytes_accessed = int(
        x_in.size * x_in.dtype.itemsize                 # x (f32 or bf16)
        + (w1t.size + w2t.size + w3t.size) * 2          # weights (bf16)
        + (b1c.size + b2c.size + b3c.size) * 4          # biases (f32)
        + B * NC * L_pad * 4                            # output (f32)
    )
    cost = pl.CostEstimate(flops=flops, transcendentals=0,
                           bytes_accessed=bytes_accessed)

    # VMEM budget: double-buffered x/out tiles + resident weights + f32/bf16
    # intermediates, 2x headroom, clamped to [32, 64] MiB (64 MiB is the full
    # per-TC VMEM on v7x).
    x_itemsize = x_in.dtype.itemsize
    tile_bytes = (C_in * tl * x_itemsize + NC * tl * 4) * 2
    weight_bytes = (w1t.size + w2t.size + w3t.size) * 2 * 2
    interm_bytes = 2 * H * tl * 4 + 2 * H * tl * 2
    vmem_limit = int(min(max(2 * (tile_bytes + weight_bytes + interm_bytes),
                             32 * 1024 * 1024),
                         64 * 1024 * 1024))

    out = pl.pallas_call(
        _mlp_decoder_kernel,
        out_shape=jax.ShapeDtypeStruct((B, NC, L_pad), jnp.float32),
        grid_spec=pltpu.PrefetchScalarGridSpec(
            num_scalar_prefetch=0,
            grid=grid,
            in_specs=[
                pl.BlockSpec((None, C_in, tl), lambda b, j: (b, 0, j)),  # x
                pl.BlockSpec((H, C_in), lambda b, j: (0, 0)),            # w1^T
                pl.BlockSpec((H, 1), lambda b, j: (0, 0)),               # b1
                pl.BlockSpec((H, H), lambda b, j: (0, 0)),               # w2^T
                pl.BlockSpec((H, 1), lambda b, j: (0, 0)),               # b2
                pl.BlockSpec((NC, H), lambda b, j: (0, 0)),              # w3^T
                pl.BlockSpec((NC, 1), lambda b, j: (0, 0)),              # b3
            ],
            out_specs=pl.BlockSpec((None, NC, tl), lambda b, j: (b, 0, j)),
        ),
        compiler_params=pltpu.CompilerParams(
            dimension_semantics=("parallel", "parallel"),
            vmem_limit_bytes=vmem_limit,
        ),
        cost_estimate=cost,
    )(x_in, w1t, b1c, w2t, b2c, w3t, b3c)

    if L_pad != L:
        out = out[:, :, :L]
    return out


def init_params(key, in_channels, hidden_channels, num_classes):
    """Weights stored as (in, out) f32 (reference does x @ W); the wrapper
    transposes/casts them for the kernel."""
    k = jax.random.split(key, 6)
    scale = 0.1
    w1 = scale * jax.random.normal(k[0], (in_channels, hidden_channels), jnp.float32)
    b1 = scale * jax.random.normal(k[1], (hidden_channels,), jnp.float32)
    w2 = scale * jax.random.normal(k[2], (hidden_channels, hidden_channels), jnp.float32)
    b2 = scale * jax.random.normal(k[3], (hidden_channels,), jnp.float32)
    w3 = scale * jax.random.normal(k[4], (hidden_channels, num_classes), jnp.float32)
    b3 = scale * jax.random.normal(k[5], (num_classes,), jnp.float32)
    return (w1, b1, w2, b2, w3, b3)


def _reference(x, params):
    w1, b1, w2, b2, w3, b3 = params
    xt = jnp.transpose(x, (0, 2, 1))
    h = jnp.maximum(xt @ w1 + b1, 0.0)
    h = jnp.maximum(h @ w2 + b2, 0.0)
    y = h @ w3 + b3
    return jnp.transpose(y, (0, 2, 1))


if __name__ == "__main__":
    key = jax.random.PRNGKey(0)
    B, C_in, L = 2, 4, 16
    hidden, num_classes = 32, 8

    kx, kp = jax.random.split(key)
    x = jax.random.normal(kx, (B, C_in, L), jnp.float32)
    params = init_params(kp, C_in, hidden, num_classes)

    fwd = jax.jit(functools.partial(mlp_decoder_forward, tl=512))
    y = fwd(x, params)
    jax.block_until_ready(y)

    y_ref = _reference(x, params)
    assert y.shape == (B, num_classes, L), y.shape
    # bf16 operands with f32 accumulation vs full-f32 reference.
    err = float(jnp.max(jnp.abs(y - y_ref)))
    assert err < 2e-2, err

    print("KERNEL_OK")
</pallas_src>

<mosaic_0001>
module attributes {stable_mosaic.version = 11 : i64} {
  func.func @_mlp_decoder_kernel(%arg0: i32, %arg1: i32, %arg2: memref<1x4x128xbf16, #tpu.memory_space<vmem>>, %arg3: memref<32x4xbf16, #tpu.memory_space<vmem>>, %arg4: memref<32x1xf32, #tpu.memory_space<vmem>>, %arg5: memref<32x32xbf16, #tpu.memory_space<vmem>>, %arg6: memref<32x1xf32, #tpu.memory_space<vmem>>, %arg7: memref<8x32xbf16, #tpu.memory_space<vmem>>, %arg8: memref<8x1xf32, #tpu.memory_space<vmem>>, %arg9: memref<1x8x128xf32, #tpu.memory_space<vmem>>) attributes {dimension_semantics = [#tpu.dimension_semantics<parallel>, #tpu.dimension_semantics<parallel>], iteration_bounds = array<i64: 2, 1>, scalar_prefetch = 0 : i64, scratch_operands = 0 : i64, tpu.core_type = #tpu.core_type<tc>, window_params = [{transform_indices = @transform_0, window_bounds = array<i64: 1, 4, 128>}, {pipeline_mode = #tpu.pipeline_mode<synchronous>, transform_indices = @transform_1, window_bounds = array<i64: 32, 4>}, {pipeline_mode = #tpu.pipeline_mode<synchronous>, transform_indices = @transform_2, window_bounds = array<i64: 32, 1>}, {pipeline_mode = #tpu.pipeline_mode<synchronous>, transform_indices = @transform_3, window_bounds = array<i64: 32, 32>}, {pipeline_mode = #tpu.pipeline_mode<synchronous>, transform_indices = @transform_4, window_bounds = array<i64: 32, 1>}, {pipeline_mode = #tpu.pipeline_mode<synchronous>, transform_indices = @transform_5, window_bounds = array<i64: 8, 32>}, {pipeline_mode = #tpu.pipeline_mode<synchronous>, transform_indices = @transform_6, window_bounds = array<i64: 8, 1>}, {transform_indices = @transform_7, window_bounds = array<i64: 1, 8, 128>}]} {
    %c0 = arith.constant 0 : index
    %c0_0 = arith.constant 0 : index
    %c0_1 = arith.constant 0 : index
    %0 = vector.load %arg2[%c0, %c0_0, %c0_1] : memref<1x4x128xbf16, #tpu.memory_space<vmem>>, vector<1x4x128xbf16>
    %1 = vector.shape_cast %0 : vector<1x4x128xbf16> to vector<4x128xbf16>
    %c0_2 = arith.constant 0 : index
    %c0_3 = arith.constant 0 : index
    %2 = vector.load %arg3[%c0_2, %c0_3] : memref<32x4xbf16, #tpu.memory_space<vmem>>, vector<32x4xbf16>
    %cst = arith.constant dense<0.000000e+00> : vector<32x128xf32>
    %3 = tpu.matmul %2, %1, %cst {dimension_numbers = #tpu.dot_dimension_numbers<[1], [0], [0], [1], [0, 0, 1, 1], [], []>} : vector<32x4xbf16>, vector<4x128xbf16>, vector<32x128xf32> -> vector<32x128xf32>
    %c0_4 = arith.constant 0 : index
    %c0_5 = arith.constant 0 : index
    %4 = vector.load %arg4[%c0_4, %c0_5] : memref<32x1xf32, #tpu.memory_space<vmem>>, vector<32x1xf32>
    %5 = vector.broadcast %4 : vector<32x1xf32> to vector<32x128xf32>
    %6 = arith.addf %3, %5 : vector<32x128xf32>
    %cst_6 = arith.constant 0.000000e+00 : f32
    %7 = vector.broadcast %cst_6 : f32 to vector<32x128xf32>
    %8 = arith.maximumf %6, %7 : vector<32x128xf32>
    %9 = arith.truncf %8 : vector<32x128xf32> to vector<32x128xbf16>
    %c0_7 = arith.constant 0 : index
    %c0_8 = arith.constant 0 : index
    %10 = vector.load %arg5[%c0_7, %c0_8] : memref<32x32xbf16, #tpu.memory_space<vmem>>, vector<32x32xbf16>
    %cst_9 = arith.constant dense<0.000000e+00> : vector<32x128xf32>
    %11 = tpu.matmul %10, %9, %cst_9 {dimension_numbers = #tpu.dot_dimension_numbers<[1], [0], [0], [1], [0, 0, 1, 1], [], []>} : vector<32x32xbf16>, vector<32x128xbf16>, vector<32x128xf32> -> vector<32x128xf32>
    %c0_10 = arith.constant 0 : index
    %c0_11 = arith.constant 0 : index
    %12 = vector.load %arg6[%c0_10, %c0_11] : memref<32x1xf32, #tpu.memory_space<vmem>>, vector<32x1xf32>
    %13 = vector.broadcast %12 : vector<32x1xf32> to vector<32x128xf32>
    %14 = arith.addf %11, %13 : vector<32x128xf32>
    %cst_12 = arith.constant 0.000000e+00 : f32
    %15 = vector.broadcast %cst_12 : f32 to vector<32x128xf32>
    %16 = arith.maximumf %14, %15 : vector<32x128xf32>
    %17 = arith.truncf %16 : vector<32x128xf32> to vector<32x128xbf16>
    %c0_13 = arith.constant 0 : index
    %c0_14 = arith.constant 0 : index
    %18 = vector.load %arg7[%c0_13, %c0_14] : memref<8x32xbf16, #tpu.memory_space<vmem>>, vector<8x32xbf16>
    %cst_15 = arith.constant dense<0.000000e+00> : vector<8x128xf32>
    %19 = tpu.matmul %18, %17, %cst_15 {dimension_numbers = #tpu.dot_dimension_numbers<[1], [0], [0], [1], [0, 0, 1, 1], [], []>} : vector<8x32xbf16>, vector<32x128xbf16>, vector<8x128xf32> -> vector<8x128xf32>
    %c0_16 = arith.constant 0 : index
    %c0_17 = arith.constant 0 : index
    %20 = vector.load %arg8[%c0_16, %c0_17] : memref<8x1xf32, #tpu.memory_space<vmem>>, vector<8x1xf32>
    %21 = vector.broadcast %20 : vector<8x1xf32> to vector<8x128xf32>
    %22 = arith.addf %19, %21 : vector<8x128xf32>
    %c0_18 = arith.constant 0 : index
    %c0_19 = arith.constant 0 : index
    %c0_20 = arith.constant 0 : index
    %23 = vector.load %arg9[%c0_18, %c0_19, %c0_20] : memref<1x8x128xf32, #tpu.memory_space<vmem>>, vector<1x8x128xf32>
    %24 = vector.shape_cast %23 : vector<1x8x128xf32> to vector<8x128xf32>
    %25 = vector.shape_cast %22 : vector<8x128xf32> to vector<1x8x128xf32>
    tpu.vector_store %arg9[%c0_18, %c0_19, %c0_20], %25 {strides = array<i32>} : memref<1x8x128xf32, #tpu.memory_space<vmem>>, vector<1x8x128xf32>,
    return
  }
  func.func @transform_0(%arg0: i32, %arg1: i32) -> (i32, i32, i32) {
    %c0_i32 = arith.constant 0 : i32
    %c0_i32_0 = arith.constant 0 : i32
    return %arg0, %c0_i32, %arg1 : i32, i32, i32
  }
  func.func @transform_1(%arg0: i32, %arg1: i32) -> (i32, i32) {
    %c0_i32 = arith.constant 0 : i32
    %c0_i32_0 = arith.constant 0 : i32
    %c0_i32_1 = arith.constant 0 : i32
    return %c0_i32, %c0_i32_0 : i32, i32
  }
  func.func @transform_2(%arg0: i32, %arg1: i32) -> (i32, i32) {
    %c0_i32 = arith.constant 0 : i32
    %c0_i32_0 = arith.constant 0 : i32
    %c0_i32_1 = arith.constant 0 : i32
    return %c0_i32, %c0_i32_0 : i32, i32
  }
  func.func @transform_3(%arg0: i32, %arg1: i32) -> (i32, i32) {
    %c0_i32 = arith.constant 0 : i32
    %c0_i32_0 = arith.constant 0 : i32
    %c0_i32_1 = arith.constant 0 : i32
    return %c0_i32, %c0_i32_0 : i32, i32
  }
  func.func @transform_4(%arg0: i32, %arg1: i32) -> (i32, i32) {
    %c0_i32 = arith.constant 0 : i32
    %c0_i32_0 = arith.constant 0 : i32
    %c0_i32_1 = arith.constant 0 : i32
    return %c0_i32, %c0_i32_0 : i32, i32
  }
  func.func @transform_5(%arg0: i32, %arg1: i32) -> (i32, i32) {
    %c0_i32 = arith.constant 0 : i32
    %c0_i32_0 = arith.constant 0 : i32
    %c0_i32_1 = arith.constant 0 : i32
    return %c0_i32, %c0_i32_0 : i32, i32
  }
  func.func @transform_6(%arg0: i32, %arg1: i32) -> (i32, i32) {
    %c0_i32 = arith.constant 0 : i32
    %c0_i32_0 = arith.constant 0 : i32
    %c0_i32_1 = arith.constant 0 : i32
    return %c0_i32, %c0_i32_0 : i32, i32
  }
  func.func @transform_7(%arg0: i32, %arg1: i32) -> (i32, i32, i32) {
    %c0_i32 = arith.constant 0 : i32
    %c0_i32_0 = arith.constant 0 : i32
    return %arg0, %c0_i32, %arg1 : i32, i32, i32
  }
}

</mosaic_0001>

<bundles_post_ra>
// kernel: mlp_decoder_forward.1
= control target key start
LH: loop header
LB: loop body
LE: loop exit
PB: predicated region body
PF: predicated region fallthrough
CT: control target
= control target key end

     0   :  { %12 = vsyncpa [#allocation3], 0  ;;  %s1039_s0 = inlined_call_operand.vmem [shape: bf16[2,4,128], index: 0, kind: input, shape index: {}]   ;;  %s1040_s1 = inlined_call_operand.vmem [shape: bf16[32,4], index: 1, kind: input, shape index: {}]   ;;  %s1041_s2 = inlined_call_operand.vmem [shape: f32[32,1], index: 2, kind: input, shape index: {}]   ;;  %s1042_s3 = inlined_call_operand.vmem [shape: bf16[32,32], index: 3, kind: input, shape index: {}]   ;;  %s1043_s4 = inlined_call_operand.vmem [shape: f32[32,1], index: 4, kind: input, shape index: {}]   ;;  %s1044_s5 = inlined_call_operand.vmem [shape: bf16[8,32], index: 5, kind: input, shape index: {}]   ;;  %s1045_s6 = inlined_call_operand.vmem [shape: f32[8,1], index: 6, kind: input, shape index: {}]   ;;  %s1046_s7 = inlined_call_operand.hbm [shape: f32[2,8,128], index: 7, kind: output, shape index: {}]  }
   0x1   :  { %14 = vsyncpa [#allocation3 + $0x1], 0  ;;  %s881_s24 = smov 0   ;;  %s883_s25 = smov 0  }
   0x2   :  { %s885_s26 = smov 0   ;;  %s887_s27 = smov 0  }
   0x3   :  { %s889_s28 = smov 0   ;;  %s891_s29 = smov 0  }
   0x4 LB: > { %s642_s30 = sadd.s32 4294967295, %s835_s29   ;;  %s643_s8 = sadd.s32 4294967294, %s835_s29   ;;  %s835_s29 = sphi %s891_s29, %s20_s29   ;;  %s831_s28 = sphi %s889_s28, %s1053_s28   ;;  %s827_s27 = sphi %s887_s27, %s1052_s27   ;;  %s823_s26 = sphi %s885_s26, %s1051_s26   ;;  %s819_s25 = sphi %s883_s25, %s1050_s25   ;;  %s815_s24 = sphi %s881_s24, %s1049_s24  }
   0x5   : > { %s32_s9 = sadd.s32 1, %s831_s28  ;;  %s195_s10 = sadd.s32 1, %s823_s26 }
   0x6   : > { %p34_p0 = scmp.ge.s32.totalorder %s32_s9, 2  ;;  %p205_p1 = scmp.ne.s32.totalorder %s823_s26, %s819_s25 }
   0x7   : > { %p206_p2 = scmp.eq.s32.totalorder %s642_s30, 1  ;;  %p211_p3 = scmp.ne.s32.totalorder %s819_s25, %s815_s24 }
   0x8   : > { %s1055_s9 = smov (%p34_p0, %s32_s9), 0  ;;  %p212_p5 = scmp.eq.s32.totalorder %s643_s8, 1 }
   0x9   : > { %p921_p4 = por %p206_p2, %p205_p1  ;;  %s190_s12 = ssub.s32 %s831_s28, %s1055_s9 }
   0xa   : > { %p646_p6 = scmp.ge.s32.totalorder %s835_s29, 1  ;;  %p193_p7 = scmp.eq.s32.totalorder %s190_s12, 0 }
   0xb   : > { %p928_p8 = por %p212_p5, %p211_p3  ;;  %p258_p9 = scmp.lt.s32.totalorder %s835_s29, 3 }
   0xc   : > { %s934_s14 = scalar_select %p193_p7, %s823_s26, %s195_s10  }
   0xd   : > { %p259_p10 = pnand %p646_p6, %p258_p9 }
   0xe   : > { %p292_p11 = scmp.lt.s32.totalorder (!%p259_p10), %s827_s27, 1  ;;  %s659_s30 = sshll.u32 (!%p259_p10), %s827_s27, 7 }
   0xf   : > { %262 = sbr.rel (%p259_p10) target bundleno = 659 (0x293), region = 48  ;;  %s993_s16 = scalar_lea.hbm (!%p259_p10), %s1046_s7, %s659_s30 }
  0x10   : > { %s840_s18 = smov (!%p259_p10), [#allocation2]  }
  0x11   : > { %s763_s19 = sshll.u32 (!%p259_p10), %s840_s18, 4  ;;  %s764_s19 = int_to_ptr.vmem [resolvable:$false] %s763_s19 }
  0x12   : > { %s765_s20 = scalar_lea.vmem (!%p259_p10), %s764_s19, 256 }
  0x14   : > { %v755_v0 = vld [vmem:[%s1040_s1] sm:$0xff]   ;;  %vm339_vm0 = vcmask 31744   ;;  %s293_s17 = scalar_select %p292_p11, %s827_s27, 1  ;;  %v307_v1 = vld [vmem:[%s1041_s2 + $0x10] sm:$0xff]  ;;  %v837_v2 = vmov 0   ;;  %vm346_vm1 = vcmask 1041408  }
  0x15   : > { %674 = vmatprep.mubr.msk.bf16.mxu0 %vm339_vm0, %v755_v0  ;;  %753 = vset.pattern.permute.xlu0 %v837_v2  ;;  %v305_v3 = vld [vmem:[%s1041_s2] sm:$0xff]  ;;  %v308_v4 = vld [vmem:[%s1041_s2 + $0x18] sm:$0xff]  ;;  %v306_v5 = vld [vmem:[%s1041_s2 + $0x8] sm:$0xff]  ;;  %vm443_vm2 = vcmask 261120   ;;  %v838_v34 = vmov 0.0   ;;  %vm839_vm3 = vmmov 0  }
  0x16   : > { %s648_s22 = sshll.u32 %s293_s17, 1  ;;  %321 = vperm.xlu0 %753, %v307_v1   ;;  %754 = vset.pattern.permute.xlu1 %v837_v2  ;;  %v756_v8 = vld [vmem:[%s1040_s1 + $0x8] sm:$0xff]   ;;  %v411_v9 = vld [vmem:[%s1043_s4 + $0x10] sm:$0xff]  ;;  %v412_v10 = vld [vmem:[%s1043_s4 + $0x18] sm:$0xff] }
  0x17   : > { %s298_s12 = scalar_lea.vmem %s1039_s0, %s648_s22  ;;  %311 = vperm.xlu1 %754, %v305_v3   ;;  %v409_v11 = vld [vmem:[%s1043_s4] sm:$0xff]  ;;  %v410_v12 = vld [vmem:[%s1043_s4 + $0x8] sm:$0xff]  ;;  %s289_s22 = sand.u32 1, %s819_s25  }
  0x18   : > { %v300_v6 = vld [vmem:[%s298_s12] sm:$0x3]  ;;  %v758_v33 = vld [vmem:[%s1042_s3 + $0x8] sm:$0xff]   ;;  %s647_s23 = sshll.u32 %s289_s22, 3  ;;  %s557_s17 = scalar_lea.sflag [#allocation3], %s289_s22 }
  0x19   : > { %694 = vmatprep.subr.msk.bf16.mxu0 %vm346_vm1, %v300_v6  ;;  %v348_v7 = vsel %vm346_vm1, %v300_v6, 0  ;;  %v506_v13 = vld [vmem:[%s1045_s6] sm:$0xff]  ;;  %s291_s8 = scalar_lea.vmem [#allocation2], %s647_s23 }
  0x1a   : > { %673 = vmatpush3.bf16.msra.mxu0 %v348_v7  ;;  %326 = vperm.xlu0 %753, %v308_v4   ;;  %v757_v14 = vld [vmem:[%s1042_s3] sm:$0xff]   ;;  %s571_s10 = sshll.u32 %s291_s8, 4  ;;  %s995_s10 = int_to_ptr.vmem [resolvable:$true] %s571_s10 }
  0x1b   : > { %316 = vperm.xlu1 %754, %v306_v5   ;;  %682 = vmatprep.mubr.msk.bf16.mxu1 %vm443_vm2, %v757_v14  ;;  %v505_v53 = vld [vmem:[%s1044_s5] sm:$0xf]  ;;  %s759_s27 = scalar_lea.vmem %s995_s10, 128  ;;  %p766_p1 = scmp.lt.s32.totalorder %s995_s10, %s764_s19 }
  0x1c   : > { %686 = vmatprep.subr.bf16.mxu0 %v838_v34  ;;  %p760_p12 = scmp.ne.s32.totalorder %s995_s10, %s759_s27  ;;  %p767_p2 = scmp.lt.s32.totalorder %s765_s20, %s759_s27 }
  0x1d   : > { %675 = vmatmul.mubr.msk.bf16.vlgmr.msra.gmra.mxu0 %vm339_vm0, %v756_v8 }
  0x1e   : > { %425 = vperm.xlu0 %753, %v411_v9   ;;  %690 = vmatprep.mubr.msk.bf16.mxu0 %vm839_vm3, %v838_v34  ;;  %p761_p13 = pnand %p760_p12, %p921_p4  ;;  %p768_p3 = por %p767_p2, %p766_p1 }
  0x1f   : > { %430 = vperm.xlu1 %754, %v412_v10  }
  0x20   : > { %p762_p0 = pneg %p761_p13 }
  0x22   : > { %415 = vperm.xlu0 %753, %v409_v11   ;;  %p769_p5 = pnand %p768_p3, %p762_p0 }
  0x23   : > { %420 = vperm.xlu1 %754, %v410_v12  }
  0x26   : > { %509 = vperm.xlu0 %753, %v506_v13  }
  0x91   : > { %v322_v15 = vpop.permute.xlu0 %321 }
  0x92   : > { %v312_v16 = vpop.permute.xlu1 %311 }
  0x95   : > { %v327_v20 = vpop.permute.xlu0 %326 }
  0x96   : > { %v317_v24 = vpop.permute.xlu1 %316 }
  0x99   : > { %v426_v35 = vpop.permute.xlu0 %425 }
  0x9a   : > { %v431_v36 = vpop.permute.xlu1 %430 }
  0x9d   : > { %v416_v41 = vpop.permute.xlu0 %415 }
  0x9e   : > { %v421_v43 = vpop.permute.xlu1 %420 }
  0xa1   : > { %v510_v54 = vpop.permute.xlu0 %509 }
  0xdd   : > { %v676_v17 = vpop.f32.mrf.mxu0 }
  0xde   : > { %v393_v19 = vadd.f32 %v676_v17, %v322_v15 }
  0xdf   : > { %v384_v18 = vpop.f32.mrf.mxu0 }
  0xe0   : > { %v385_v22 = vadd.f32 %v384_v18, %v312_v16  ;;  %v401_v26 = vmax.f32 %v393_v19, 0.0 }
  0xe1   : > { %v677_v21 = vpop.f32.mrf.mxu0 }
  0xe2   : > { %v396_v23 = vadd.f32 %v677_v21, %v327_v20  ;;  %v399_v29 = vmax.f32 %v385_v22, 0.0 }
  0xe3   : > { %v387_v25 = vpop.f32.mrf.mxu0 }
  0xe4   : > { %v402_v27 = vmax.f32 %v396_v23, 0.0  ;;  %v388_v28 = vadd.f32 %v387_v25, %v317_v24 }
  0xe6   : > { %v400_v30 = vmax.f32 %v388_v28, 0.0  ;;  %v404_v31 = vpack.c.bf16 %v402_v27, %v401_v26 }
  0xe8   : > { %v403_v32 = vpack.c.bf16 %v400_v30, %v399_v29  ;;  %678 = vmatprep.subr.bf16.mxu1 %v404_v31 }
  0xe9   : > { %679 = vmatpush3.bf16.msra.mxu1 %v404_v31 }
  0xea   : > { %680 = vmatprep.subr.bf16.mxu1 %v403_v32 }
  0xed   : > { %681 = vmatpush3.bf16.msra.mxu1 %v403_v32 }
  0xf0   : > { %683 = vmatmul.mubr.msk.bf16.vlgmr.msra.gmra.mxu1 %vm443_vm2, %v758_v33 }
 0x1b0   : > { %v684_v37 = vpop.f32.mrf.mxu1 }
 0x1b1   : > { %v493_v39 = vadd.f32 %v684_v37, %v426_v35 }
 0x1b2   : > { %v484_v38 = vpop.f32.mrf.mxu1 }
 0x1b3   : > { %v501_v45 = vmax.f32 %v493_v39, 0.0  ;;  %v485_v46 = vadd.f32 %v484_v38, %v416_v41 }
 0x1b4   : > { %v685_v40 = vpop.f32.mrf.mxu1 }
 0x1b5   : > { %v496_v42 = vadd.f32 %v685_v40, %v431_v36  ;;  %v499_v51 = vmax.f32 %v485_v46, 0.0 }
 0x1b6   : > { %v487_v44 = vpop.f32.mrf.mxu1 }
 0x1b7   : > { %v502_v47 = vmax.f32 %v496_v42, 0.0  ;;  %v488_v48 = vadd.f32 %v487_v44, %v421_v43 }
 0x1b9   : > { %v504_v49 = vpack.c.bf16 %v502_v47, %v501_v45  ;;  %v500_v50 = vmax.f32 %v488_v48, 0.0 }
 0x1bb   : > { %687 = vmatpush3.bf16.msra.mxu0 %v504_v49  ;;  %v503_v52 = vpack.c.bf16 %v500_v50, %v499_v51 }
 0x1bc   : > { %688 = vmatprep.subr.bf16.mxu0 %v838_v34 }
 0x1bf   : > { %689 = vmatpush3.bf16.msra.mxu0 %v503_v52 }
 0x1c2   : > { %691 = vmatmul.mubr.msk.bf16.vlgmr.msra.gmra.mxu0 %vm443_vm2, %v505_v53 }
 0x282   : > { %v549_v55 = vpop.f32.mrf.mxu0 }
 0x283   : > { %v550_v56 = vadd.f32 %v549_v55, %v510_v54 }
 0x284   : > { %v692_v57 = vpop.f32.mrf.mxu0 }
 0x285   : > { %555 = vst [vmem:[%s291_s8] sm:$0xff] %v550_v56 }
 0x286   : > { %v552_v58 = vpop.f32.mrf.mxu0 }
 0x287   : > { %772 = shalt.err (!%p769_p5)
}
 0x288   : > { %s773_s21 = scalar_lea.hbm %s993_s16, 128  ;;  %s777_s30 = scalar_lea.hbm %s1046_s7, 256 }
 0x289   : > { %p774_p6 = scmp.ne.s32.totalorder %s993_s16, %s773_s21  ;;  %p778_p10 = scmp.lt.s32.totalorder %s993_s16, %s1046_s7 }
 0x28a   : > { %p779_p11 = scmp.lt.s32.totalorder %s777_s30, %s773_s21 }
 0x28b   : > { %p775_p7 = pnand %p774_p6, %p921_p4 }
 0x28c   : > { %p780_p12 = por %p779_p11, %p778_p10 }
 0x28d   : > { %p776_p9 = pneg %p775_p7 }
 0x28f   : > { %p781_p13 = pnand %p780_p12, %p776_p9 }
 0x291   : > { %784 = shalt.err (!%p781_p13)
}
 0x292   : > { %695 = dma.vmem_to_hbm [thread:$0]  (%p921_p4), %s995_s10, 128, %s993_s16, %s557_s17   ;;  %v693_v59 = vpop.f32.mrf.mxu0 }
 0x293 PF: > { %p701_p0 = scmp.ge.s32.totalorder %s835_s29, 2  ;;  %s583_s15 = sand.u32 1, %s815_s24  }
 0x294   : > { %s584_s27 = scalar_lea.sflag [#allocation3], %s583_s15 }
 0x295   : > { %p698_p1 = pnand %p701_p0, %p928_p8 }
 0x297   : > { %p699_p2 = pneg %p698_p1 }
 0x299   : > { %810 = dma.done.wait (%p699_p2), %s584_s27, 128  }
 0x29a   : > { %812 = vsyncadd (%p699_p2), %s584_s27, 4294967168  ;;  %s20_s29 = sadd.s32 1, %s835_s29   ;;  %s1049_s24 = smov %s819_s25 }
 0x29b   : > { %p17_p3 = scmp.ge.s32.totalorder %s20_s29, 4   ;;  %s1050_s25 = smov %s823_s26 }
 0x29c   : > { %s1051_s26 = smov %s934_s14  ;;  %s1052_s27 = smov %s831_s28 }
 0x29d   : > { %s1053_s28 = smov %s1055_s9  ;;  %19 = sbr.rel (!%p17_p3) target bundleno = 4 (0x4), region = 83 }
 0x2a2   :  { %589 = vsyncpa [#allocation3], 1 }
 0x2a3   :  { %591 = vsyncpa [#allocation3 + $0x1], 1 }

</bundles_post_ra>
